<compile_context>
chip_gen: v5e
topology: v5e:2x2
jax: 0.10.0
libtpu: 0.0.40
codegen_flags: <defaults>
</compile_context>

<pallas_src>
import math
import jax
import jax.numpy as jnp
from jax.experimental import pallas as pl
from jax.experimental.pallas import tpu as pltpu


def _to_2tuple(v):
    return tuple(v) if isinstance(v, (tuple, list)) else (v, v)


def _get_pad_shape(input_hw, kernel_size, stride, dilation):
    input_h, input_w = input_hw
    kernel_h, kernel_w = kernel_size
    stride_h, stride_w = stride
    dil_h, dil_w = dilation
    output_h = math.ceil(input_h / stride_h)
    output_w = math.ceil(input_w / stride_w)
    pad_h = max((output_h - 1) * stride_h + (kernel_h - 1) * dil_h + 1 - input_h, 0)
    pad_w = max((output_w - 1) * stride_w + (kernel_w - 1) * dil_w + 1 - input_w, 0)
    return pad_h, pad_w


def _round_up(a, b):
    return ((a + b - 1) // b) * b


def _vmem_capacity_bytes():
    """Per-TensorCore VMEM capacity; conservative v7x default if query fails."""
    try:
        return int(pltpu.get_tpu_info().vmem_capacity_bytes)
    except Exception:
        return 64 << 20


def _pick_tile_nc(nc, per_slice_pair_bytes, pair_budget_bytes):
    """Largest leading-dim tile whose (in + out) resident footprint fits.

    Prefers an exact divisor of nc (no partial trailing block) unless that
    would cost more than ~25% of the achievable tile size; otherwise returns
    the max tile and relies on a cdiv grid with a masked partial last block.
    """
    max_tile = max(1, min(nc, pair_budget_bytes // max(per_slice_pair_bytes, 1)))
    best_div = 1
    for d in range(1, max_tile + 1):
        if nc % d == 0:
            best_div = d
    if best_div * 4 >= max_tile * 3:
        return best_div
    return max_tile


def _make_pad_kernel(H, W, H_out, W_out, top, left):
    pad_bottom = H_out - top - H
    pad_right = W_out - left - W

    def pad_kernel(x_ref, o_ref):
        t = x_ref.shape[0]
        dt = x_ref.dtype
        x = x_ref[...]

        # Build the padded tile in registers: pad W (lanes) first, then H
        # (sublanes).  All padding amounts are Python ints -> static shapes.
        row = x
        if left > 0 or pad_right > 0:
            parts = []
            if left > 0:
                parts.append(jnp.zeros((t, H, left), dt))
            parts.append(row)
            if pad_right > 0:
                parts.append(jnp.zeros((t, H, pad_right), dt))
            row = jnp.concatenate(parts, axis=2)

        out = row
        if top > 0 or pad_bottom > 0:
            parts = []
            if top > 0:
                parts.append(jnp.zeros((t, top, W_out), dt))
            parts.append(row)
            if pad_bottom > 0:
                parts.append(jnp.zeros((t, pad_bottom, W_out), dt))
            out = jnp.concatenate(parts, axis=1)

        # Single dense full-block store.
        o_ref[...] = out

    return pad_kernel


def adaptive_padding(x, kernel_size=1, stride=1, dilation=1, padding='corner'):
    """Pallas implementation of AdaptivePadding.forward for NCHW input."""
    assert padding in ('same', 'corner')
    kernel_size = _to_2tuple(kernel_size)
    stride = _to_2tuple(stride)
    dilation = _to_2tuple(dilation)

    N, C, H, W = x.shape
    pad_h, pad_w = _get_pad_shape((H, W), kernel_size, stride, dilation)

    if pad_h == 0 and pad_w == 0:
        # Matches PyTorch: no padding needed -> return input unchanged.
        return x

    if padding == 'corner':
        top, left = 0, 0
    else:  # 'same'
        top, left = pad_h // 2, pad_w // 2

    H_out, W_out = H + pad_h, W + pad_w
    NC = N * C

    itemsize = jnp.dtype(x.dtype).itemsize
    sublane = max(8, 32 // itemsize)  # 8 for f32, 16 for bf16, 32 for int8

    # Real resident VMEM footprint per (n, c) slice: rows round to the sublane
    # multiple, cols to 128 lanes (for W=17 this is ~8x the raw byte count).
    in_slice = _round_up(H, sublane) * _round_up(W, 128) * itemsize
    out_slice = _round_up(H_out, sublane) * _round_up(W_out, 128) * itemsize
    per_slice_pair = in_slice + out_slice

    vmem_cap = _vmem_capacity_bytes()
    # Generation-aware: double-buffered (in + out) pair must fit under capacity
    # with >=16 MiB headroom; never more than 48 MiB even on 128 MiB parts.
    pair_budget = max(8 << 20, min((vmem_cap - (16 << 20)) // 2, 48 << 20))
    tile_nc = _pick_tile_nc(NC, per_slice_pair, pair_budget)

    need = 2 * tile_nc * per_slice_pair + (4 << 20)
    vmem_limit = int(min(max(need, 32 << 20), vmem_cap - (8 << 20)))

    kernel = _make_pad_kernel(H, W, H_out, W_out, top, left)

    # Fold N and C into one flat axis (free metadata reshape for contiguous
    # NCHW): single flat "parallel" grid axis, even megacore split on v7x.
    x3 = x.reshape(NC, H, W)
    out3 = pl.pallas_call(
        kernel,
        out_shape=jax.ShapeDtypeStruct((NC, H_out, W_out), x.dtype),
        grid=(pl.cdiv(NC, tile_nc),),
        in_specs=[pl.BlockSpec((tile_nc, H, W), lambda i: (i, 0, 0))],
        out_specs=pl.BlockSpec((tile_nc, H_out, W_out), lambda i: (i, 0, 0)),
        compiler_params=pltpu.CompilerParams(
            dimension_semantics=("parallel",),
            vmem_limit_bytes=vmem_limit,
        ),
    )(x3)
    return out3.reshape(N, C, H_out, W_out)


def _reference(x, kernel_size, stride, dilation, padding):
    """Pure-JAX reference mirroring the PyTorch F.pad semantics."""
    kernel_size = _to_2tuple(kernel_size)
    stride = _to_2tuple(stride)
    dilation = _to_2tuple(dilation)
    H, W = x.shape[-2:]
    pad_h, pad_w = _get_pad_shape((H, W), kernel_size, stride, dilation)
    if pad_h == 0 and pad_w == 0:
        return x
    if padding == 'corner':
        pads = ((0, 0), (0, 0), (0, pad_h), (0, pad_w))
    else:
        pads = ((0, 0), (0, 0),
                (pad_h // 2, pad_h - pad_h // 2),
                (pad_w // 2, pad_w - pad_w // 2))
    return jnp.pad(x, pads)


if __name__ == "__main__":
    key = jax.random.PRNGKey(0)
    # Mirrors the docstring example: kernel 16, stride 16, input 15x17 -> 16x32.
    x = jax.random.normal(key, (2, 4, 15, 17), dtype=jnp.float32)

    out_corner = adaptive_padding(x, kernel_size=16, stride=16, dilation=1,
                                  padding='corner')
    jax.block_until_ready(out_corner)
    ref_corner = _reference(x, 16, 16, 1, 'corner')
    assert out_corner.shape == (2, 4, 16, 32), out_corner.shape
    assert jnp.allclose(out_corner, ref_corner), "corner padding mismatch"

    out_same = adaptive_padding(x, kernel_size=16, stride=16, dilation=1,
                                padding='same')
    jax.block_until_ready(out_same)
    ref_same = _reference(x, 16, 16, 1, 'same')
    assert out_same.shape == (2, 4, 16, 32), out_same.shape
    assert jnp.allclose(out_same, ref_same), "same padding mismatch"

    # Odd pad amounts ('same' splits unevenly: larger half on bottom/right).
    x3 = jax.random.normal(jax.random.PRNGKey(2), (2, 4, 13, 14), jnp.float32)
    out3 = adaptive_padding(x3, kernel_size=16, stride=16, dilation=1,
                            padding='same')
    jax.block_until_ready(out3)
    ref3 = _reference(x3, 16, 16, 1, 'same')
    assert out3.shape == ref3.shape, (out3.shape, ref3.shape)
    assert jnp.allclose(out3, ref3), "same padding (odd pads) mismatch"

    # Awkward (prime-ish) N*C exercises the cdiv / partial-block path safely.
    x5 = jax.random.normal(jax.random.PRNGKey(3), (1, 3, 15, 17), jnp.float32)
    out5 = adaptive_padding(x5, kernel_size=16, stride=16, dilation=1,
                            padding='corner')
    jax.block_until_ready(out5)
    ref5 = _reference(x5, 16, 16, 1, 'corner')
    assert out5.shape == ref5.shape
    assert jnp.allclose(out5, ref5), "prime-NC corner padding mismatch"

    # No-pad path (input already divisible): returns input unchanged.
    x2 = jax.random.normal(jax.random.PRNGKey(1), (2, 4, 16, 16), jnp.float32)
    out_nopad = adaptive_padding(x2, kernel_size=16, stride=16, dilation=1,
                                 padding='corner')
    jax.block_until_ready(out_nopad)
    assert out_nopad.shape == x2.shape
    assert jnp.allclose(out_nopad, x2)

    print("KERNEL_OK")
</pallas_src>

<mosaic_0001>
module attributes {stable_mosaic.version = 11 : i64} {
  func.func @pad_kernel(%arg0: i32, %arg1: memref<8x15x17xf32, #tpu.memory_space<vmem>>, %arg2: memref<8x16x32xf32, #tpu.memory_space<vmem>>) attributes {dimension_semantics = [#tpu.dimension_semantics<parallel>], iteration_bounds = array<i64: 1>, scalar_prefetch = 0 : i64, scratch_operands = 0 : i64, tpu.core_type = #tpu.core_type<tc>, window_params = [{transform_indices = @transform_0, window_bounds = array<i64: 8, 15, 17>}, {transform_indices = @transform_1, window_bounds = array<i64: 8, 16, 32>}]} {
    %c0 = arith.constant 0 : index
    %c0_0 = arith.constant 0 : index
    %c0_1 = arith.constant 0 : index
    %0 = vector.load %arg1[%c0, %c0_0, %c0_1] : memref<8x15x17xf32, #tpu.memory_space<vmem>>, vector<8x15x17xf32>
    %cst = arith.constant 0.000000e+00 : f32
    %1 = vector.broadcast %cst : f32 to vector<8x15x15xf32>
    %2 = tpu.concatenate %0, %1 in 2 : vector<8x15x17xf32>, vector<8x15x15xf32> -> vector<8x15x32xf32>
    %cst_2 = arith.constant 0.000000e+00 : f32
    %3 = vector.broadcast %cst_2 : f32 to vector<8x1x32xf32>
    %4 = tpu.concatenate %2, %3 in 1 : vector<8x15x32xf32>, vector<8x1x32xf32> -> vector<8x16x32xf32>
    %c0_3 = arith.constant 0 : index
    %c0_4 = arith.constant 0 : index
    %c0_5 = arith.constant 0 : index
    %5 = vector.load %arg2[%c0_3, %c0_4, %c0_5] : memref<8x16x32xf32, #tpu.memory_space<vmem>>, vector<8x16x32xf32>
    tpu.vector_store %arg2[%c0_3, %c0_4, %c0_5], %4 {strides = array<i32>} : memref<8x16x32xf32, #tpu.memory_space<vmem>>, vector<8x16x32xf32>,
    return
  }
  func.func @transform_0(%arg0: i32) -> (i32, i32, i32) {
    %c0_i32 = arith.constant 0 : i32
    %c0_i32_0 = arith.constant 0 : i32
    %c0_i32_1 = arith.constant 0 : i32
    return %arg0, %c0_i32, %c0_i32_0 : i32, i32, i32
  }
  func.func @transform_1(%arg0: i32) -> (i32, i32, i32) {
    %c0_i32 = arith.constant 0 : i32
    %c0_i32_0 = arith.constant 0 : i32
    %c0_i32_1 = arith.constant 0 : i32
    return %arg0, %c0_i32, %c0_i32_0 : i32, i32, i32
  }
}

</mosaic_0001>

<bundles_post_ra>
// kernel: tpu_custom_call.1
= control target key start
LH: loop header
LB: loop body
LE: loop exit
PB: predicated region body
PF: predicated region fallthrough
CT: control target
= control target key end

     0   :  { %vm25_vm0 = vcmask 138240   ;;  %vm51_vm1 = vcmask 261120   ;;  %vm42_vm2 = vcmask 1046528   ;;  %s219_s0 = inlined_call_operand.vmem [shape: f32[8,15,17], index: 0, kind: input, shape index: {}]   ;;  %s220_s1 = inlined_call_operand.hbm [shape: f32[8,16,32], index: 1, kind: output, shape index: {}]  }
   0x1   :  { %v9_v0 = vld [vmem:[%s219_s0] sm:$0xff]  ;;  %v10_v1 = vld [vmem:[%s219_s0 + $0x8] sm:$0x7f]  ;;  %v11_v4 = vld [vmem:[%s219_s0 + $0x10] sm:$0xff] }
   0x2   :  { %v26_v2 = vsel %vm25_vm0, %v9_v0, 0.0  ;;  %v27_v3 = vsel %vm25_vm0, %v10_v1, 0.0  ;;  %v12_v5 = vld [vmem:[%s219_s0 + $0x18] sm:$0x7f]  ;;  %v13_v6 = vld [vmem:[%s219_s0 + $0x20] sm:$0xff]  ;;  %v28_v8 = vsel %vm25_vm0, %v11_v4, 0.0 }
   0x3   :  { %52 = vst.msk [vmem:[#allocation2] sm:$0xff] %vm51_vm1, %v26_v2  ;;  %v43_v7 = vsel %vm42_vm2, %v27_v3, 0.0  ;;  %v29_v9 = vsel %vm25_vm0, %v12_v5, 0.0  ;;  %v15_v10 = vld [vmem:[%s219_s0 + $0x30] sm:$0xff]  ;;  %v30_v12 = vsel %vm25_vm0, %v13_v6, 0.0  ;;  %v17_v16 = vld [vmem:[%s219_s0 + $0x40] sm:$0xff] }
   0x4   :  { %53 = vst.msk [vmem:[#allocation2 + $0x8] sm:$0xff] %vm51_vm1, %v43_v7  ;;  %v44_v11 = vsel %vm42_vm2, %v29_v9, 0.0  ;;  %v14_v13 = vld [vmem:[%s219_s0 + $0x28] sm:$0x7f]  ;;  %v16_v15 = vld [vmem:[%s219_s0 + $0x38] sm:$0x7f] }
   0x5   :  { %54 = vst.msk [vmem:[#allocation2 + $0x10] sm:$0xff] %vm51_vm1, %v28_v8  ;;  %v31_v14 = vsel %vm25_vm0, %v14_v13, 0.0  ;;  %v32_v18 = vsel %vm25_vm0, %v15_v10, 0.0  ;;  %v33_v19 = vsel %vm25_vm0, %v16_v15, 0.0  ;;  %v18_v20 = vld [vmem:[%s219_s0 + $0x48] sm:$0x7f] }
   0x6   :  { %55 = vst.msk [vmem:[#allocation2 + $0x18] sm:$0xff] %vm51_vm1, %v44_v11  ;;  %v45_v17 = vsel %vm42_vm2, %v31_v14, 0.0  ;;  %v46_v21 = vsel %vm42_vm2, %v33_v19, 0.0  ;;  %v35_v22 = vsel %vm25_vm0, %v18_v20, 0.0  ;;  %v19_v23 = vld [vmem:[%s219_s0 + $0x50] sm:$0xff]  ;;  %v34_v25 = vsel %vm25_vm0, %v17_v16, 0.0 }
   0x7   :  { %56 = vst.msk [vmem:[#allocation2 + $0x20] sm:$0xff] %vm51_vm1, %v30_v12  ;;  %v20_v24 = vld [vmem:[%s219_s0 + $0x58] sm:$0x7f]  ;;  %v22_v27 = vld [vmem:[%s219_s0 + $0x68] sm:$0x7f]  ;;  %v47_v28 = vsel %vm42_vm2, %v35_v22, 0.0 }
   0x8   :  { %57 = vst.msk [vmem:[#allocation2 + $0x28] sm:$0xff] %vm51_vm1, %v45_v17  ;;  %v37_v26 = vsel %vm25_vm0, %v20_v24, 0.0  ;;  %v21_v29 = vld [vmem:[%s219_s0 + $0x60] sm:$0xff]  ;;  %v24_v30 = vld [vmem:[%s219_s0 + $0x78] sm:$0x7f]  ;;  %v36_v31 = vsel %vm25_vm0, %v19_v23, 0.0 }
   0x9   :  { %58 = vst.msk [vmem:[#allocation2 + $0x30] sm:$0xff] %vm51_vm1, %v32_v18  ;;  %v39_v32 = vsel %vm25_vm0, %v22_v27, 0.0 }
   0xa   :  { %59 = vst.msk [vmem:[#allocation2 + $0x38] sm:$0xff] %vm51_vm1, %v46_v21 }
   0xb   :  { %6 = vsyncpa [#allocation3], 0  ;;  %60 = vst.msk [vmem:[#allocation2 + $0x40] sm:$0xff] %vm51_vm1, %v34_v25  ;;  %v48_v33 = vsel %vm42_vm2, %v37_v26, 0.0  ;;  %v23_v34 = vld [vmem:[%s219_s0 + $0x70] sm:$0xff]  ;;  %v38_v35 = vsel %vm25_vm0, %v21_v29, 0.0 }
   0xc   :  { %61 = vst.msk [vmem:[#allocation2 + $0x48] sm:$0xff] %vm51_vm1, %v47_v28  ;;  %v41_v36 = vsel %vm25_vm0, %v24_v30, 0.0  ;;  %s115_s9 = smov [#allocation2]   ;;  %s74_s13 = sshll.u32 %s220_s1, 4  ;;  %v49_v37 = vsel %vm42_vm2, %v39_v32, 0.0  ;;  %v40_v38 = vsel %vm25_vm0, %v23_v34, 0.0  ;;  %s75_s13 = int_to_ptr.hbm [resolvable:$true] %s74_s13 }
   0xd   :  { %s72_s10 = sshll.u32 %s115_s9, 4  ;;  %62 = vst.msk [vmem:[#allocation2 + $0x50] sm:$0xff] %vm51_vm1, %v36_v31  ;;  %v50_v39 = vsel %vm42_vm2, %v41_v36, 0.0  ;;  %s116_s0 = smov 128   ;;  %s73_s10 = int_to_ptr.vmem [resolvable:$true] %s72_s10 }
   0xe   :  { %63 = vst.msk [vmem:[#allocation2 + $0x58] sm:$0xff] %vm51_vm1, %v48_v33  ;;  %s117_s1 = smov 8  }
   0xf   :  { %64 = vst.msk [vmem:[#allocation2 + $0x60] sm:$0xff] %vm51_vm1, %v38_v35 }
  0x10   :  { %65 = vst.msk [vmem:[#allocation2 + $0x68] sm:$0xff] %vm51_vm1, %v49_v37 }
  0x11   :  { %66 = vst.msk [vmem:[#allocation2 + $0x70] sm:$0xff] %vm51_vm1, %v40_v38 }
  0x12   :  { %67 = vst.msk [vmem:[#allocation2 + $0x78] sm:$0xff] %vm51_vm1, %v50_v39 }
  0x13   :  { %80 = dma.vmem_to_hbm [thread:$0]  %s73_s10, 2048, %s75_s13, [#allocation3], %s116_s0, %s116_s0, %s117_s1  }
  0x14   :  { %113 = dma.done.wait [#allocation3], 2048  }
  0x15   :  { %114 = vsyncadd [#allocation3], 4294965248 }
  0x16   :  { %85 = vsyncpa [#allocation3], 1 }

</bundles_post_ra>
